<compile_context>
chip_gen: v6e
topology: v6e:2x2x1
jax: 0.10.0
libtpu: 0.0.40
codegen_flags: <defaults>
</compile_context>

<pallas_src>
import functools
import math

import jax
import jax.numpy as jnp
from jax import lax
from jax.experimental import pallas as pl
from jax.experimental.pallas import tpu as pltpu

_BF16 = jnp.bfloat16
_F32 = jnp.float32


# ----------------------------------------------------------------------------
# Fused Pallas kernel
# ----------------------------------------------------------------------------
def _vmem():
    # whole arrays resident in VMEM (shapes here are tiny)
    return pl.BlockSpec(memory_space=pltpu.MemorySpace.VMEM)


def make_fused_grapher_kernel(num_layer, num_cand):
    """Build the fused kernel body for static (num_layer, num_candidates)."""

    def kernel(*refs):
        adj_ref, x_ref, ssum_ref, sdiff_ref, temb_ref = refs[:5]
        layer_refs = refs[5:5 + 4 * num_layer]
        (w1c_ref, w1ft_ref, b1_ref, w2t_ref, b2_ref,
         o_ref) = refs[5 + 4 * num_layer:]

        adj = adj_ref[...]                     # bf16 [N, N]  == A + I (eps=0 folded)
        h = x_ref[...]                         # bf16 [N, Cin]

        # ---- GIN layers, statically unrolled, h stays in VMEM/vregs ----
        for i in range(num_layer):
            w1 = layer_refs[4 * i][...]        # bf16
            b1 = layer_refs[4 * i + 1][...]    # f32 [1, H]
            w2 = layer_refs[4 * i + 2][...]    # bf16
            b2 = layer_refs[4 * i + 3][...]    # f32 [1, H]
            agg = jnp.dot(adj, h, preferred_element_type=jnp.float32).astype(_BF16)
            z = jnp.maximum(
                jnp.dot(agg, w1, preferred_element_type=jnp.float32) + b1, 0.0
            ).astype(_BF16)
            h = (jnp.dot(z, w2, preferred_element_type=jnp.float32) + b2
                 ).astype(_BF16)

        # ---- endpoint sums / |diffs| with 2 consolidated selection matmuls ----
        # rows 0..C-1: candidate edges, row C: the first edge (exact: +-1 / one-hot).
        sums = jnp.dot(ssum_ref[...], h, preferred_element_type=jnp.float32)   # [C+1,H]
        diffs = jnp.abs(
            jnp.dot(sdiff_ref[...], h, preferred_element_type=jnp.float32))    # [C+1,H]

        cs = sums[:num_cand].astype(_BF16)                  # [C, H] candidate sums
        cd = diffs[:num_cand].astype(_BF16)                 # [C, H] candidate |diff|s
        fs = sums[num_cand:num_cand + 1].astype(_BF16)      # [1, H] first-edge sum
        fd = diffs[num_cand:num_cand + 1].astype(_BF16)     # [1, H] first-edge |diff|

        # constant part of predictor Linear1 (first-edge + time-embed + bias)
        # as one [1,3H] x [3H,H] matmul
        first_t = jnp.concatenate([fs, fd, temb_ref[...].astype(_BF16)], axis=-1)
        const = (jnp.dot(first_t, w1ft_ref[...], preferred_element_type=jnp.float32)
                 + b1_ref[...])                                             # [1, H]

        cand = jnp.concatenate([cs, cd], axis=-1)                           # [C, 2H]
        z1 = jnp.maximum(
            jnp.dot(cand, w1c_ref[...], preferred_element_type=jnp.float32) + const,
            0.0)                                                            # [C, H] f32

        # lane-dense logits [1, C]: contract both operands on H (no materialized .T)
        logits = lax.dot_general(
            w2t_ref[...], z1.astype(_BF16),
            dimension_numbers=(((1,), (1,)), ((), ())),
            preferred_element_type=jnp.float32)                             # [1, C]
        o_ref[...] = logits + b2_ref[...]

    return kernel


def fused_grapher(adj_i, x, s_sum, s_diff, t_embed, layer_ws,
                  w1_cand, w1_ft, b1, w2t, b2):
    """Single pallas_call running the whole GraphER forward.  Returns logits [C]."""
    c = s_sum.shape[0] - 1
    n = adj_i.shape[0]
    h = b1.shape[1]
    cin = x.shape[1]
    num_layer = len(layer_ws)

    kernel = make_fused_grapher_kernel(num_layer, c)
    flat_layers = [a for lw in layer_ws for a in lw]
    args = [adj_i, x, s_sum, s_diff, t_embed] + flat_layers + [w1_cand, w1_ft,
                                                               b1, w2t, b2]

    # advisory cost estimate so XLA can overlap surrounding tiny HLOs
    dims = [cin] + [h] * num_layer
    flops = 0
    for i in range(num_layer):
        flops += 2 * n * n * dims[i]              # (A+I) @ h
        flops += 2 * n * dims[i] * h + 2 * n * h * h
    flops += 2 * 2 * (c + 1) * n * h              # selection matmuls
    flops += 2 * 3 * h * h + 2 * c * 2 * h * h + 2 * c * h
    bytes_accessed = int(sum(int(a.size) * a.dtype.itemsize for a in args)) + 4 * c
    cost = pl.CostEstimate(flops=int(flops), transcendentals=0,
                           bytes_accessed=bytes_accessed)

    # explicit scoped-VMEM limit: never below 32 MiB (v5e defaults to 16 MiB),
    # footprint-aware above that.  TODO(synk): tiled aggregation for N >~ 2-4k.
    footprint = int(sum(int(a.size) * a.dtype.itemsize for a in args))
    vmem_limit = int(min(max(32 * 1024 * 1024, 2 * footprint + (2 << 20)),
                         64 * 1024 * 1024))

    out = pl.pallas_call(
        kernel,
        out_shape=jax.ShapeDtypeStruct((1, c), _F32),
        in_specs=[_vmem()] * len(args),
        out_specs=_vmem(),
        cost_estimate=cost,
        compiler_params=pltpu.CompilerParams(vmem_limit_bytes=vmem_limit),
    )(*args)
    return out[0]  # [C]


# ----------------------------------------------------------------------------
# Plain-JAX glue (sinusoid, adjacency / selection build, parameter handling)
# ----------------------------------------------------------------------------
def get_sinusoidal_embedding(t, dim, max_period=10000):
    half_dim = dim // 2
    freqs = jnp.exp(
        -jnp.arange(half_dim, dtype=_F32) * (math.log(max_period) / half_dim)
    )
    args = jnp.asarray(t, _F32) * freqs
    # NOTE: [sin, cos] ordering matches the PyTorch reference above.
    return jnp.concatenate([jnp.sin(args), jnp.cos(args)], axis=-1)  # [dim]


def init_linear(key, fan_in, fan_out):
    # deterministic, PyTorch-Linear-like uniform(-1/sqrt(fan_in), 1/sqrt(fan_in))
    kw, kb = jax.random.split(key)
    bound = 1.0 / math.sqrt(fan_in)
    w = jax.random.uniform(kw, (fan_in, fan_out), _F32, -bound, bound)
    b = jax.random.uniform(kb, (1, fan_out), _F32, -bound, bound)
    return w, b


def init_grapher_params(key, in_channels, hidden_dim, num_layer):
    assert hidden_dim % 2 == 0, "hidden_dim must be even (sinusoidal embedding)"
    params = {"gin": [], "edge_pred": None}
    keys = jax.random.split(key, num_layer + 1)
    for i in range(num_layer):
        k1, k2 = jax.random.split(keys[i])
        cin = in_channels if i == 0 else hidden_dim
        w1, b1 = init_linear(k1, cin, hidden_dim)
        w2, b2 = init_linear(k2, hidden_dim, hidden_dim)
        params["gin"].append((w1, b1, w2, b2))
    k1, k2 = jax.random.split(keys[-1])
    pw1, pb1 = init_linear(k1, hidden_dim * 4 + hidden_dim, hidden_dim)
    pw2, pb2 = init_linear(k2, hidden_dim, 1)
    params["edge_pred"] = (pw1, pb1, pw2, pb2)
    return params


def prepare_params(params):
    """Cast MXU operands to bf16 once; split/stack the predictor's Linear1
    [5H,H] into a candidate block [2H,H] and a (first-edge + time) block [3H,H];
    pre-transpose its Linear2 weight to a lane-dense [1,H] row."""
    hidden = params["gin"][0][2].shape[0]
    gin = [(w1.astype(_BF16), b1.astype(_F32), w2.astype(_BF16), b2.astype(_F32))
           for (w1, b1, w2, b2) in params["gin"]]
    pw1, pb1, pw2, pb2 = params["edge_pred"]
    h = hidden
    # feat layout: [first_sum(H), first_absdiff(H), cand_sum(H), cand_absdiff(H), t(H)]
    w1_cand = pw1[2 * h:4 * h].astype(_BF16)                             # [2H, H]
    w1_ft = jnp.concatenate([pw1[0:2 * h], pw1[4 * h:5 * h]], axis=0
                            ).astype(_BF16)                              # [3H, H]
    return {
        "gin": gin,
        "w1_cand": w1_cand,
        "w1_ft": w1_ft,
        "b1": pb1.astype(_F32),                  # [1, H]
        "w2t": pw2.T.astype(_BF16),              # [1, H]
        "b2": pb2.astype(_F32),                  # [1, 1]
        "hidden": hidden,
    }


def precompute_graph_constants(n, edge_index, first_edge, candidate_edges):
    """Graph-dependent constants (hoistable across repeated forward calls)."""
    src, dst = edge_index[0], edge_index[1]
    # dense adjacency with the GIN self-term folded in (eps=0):
    # (A + I)[i, j] = #messages j -> i  (+1 on the diagonal)
    adj = jnp.zeros((n, n), _F32).at[dst, src].add(1.0)
    adj_i = (adj + jnp.eye(n, dtype=_F32)).astype(_BF16)                 # [N, N]
    cu = jax.nn.one_hot(candidate_edges[:, 0], n, dtype=_F32)            # [C, N]
    cv = jax.nn.one_hot(candidate_edges[:, 1], n, dtype=_F32)            # [C, N]
    fu = jax.nn.one_hot(first_edge[0:1], n, dtype=_F32)                  # [1, N]
    fv = jax.nn.one_hot(first_edge[1:2], n, dtype=_F32)                  # [1, N]
    s_sum = jnp.concatenate([cu + cv, fu + fv], axis=0).astype(_BF16)    # [C+1, N]
    s_diff = jnp.concatenate([cu - cv, fu - fv], axis=0).astype(_BF16)   # [C+1, N]
    return adj_i, s_sum, s_diff


def grapher_apply(pp, x, graph_consts, t):
    """Core forward: prepared params + precomputed graph constants -> logits [C]."""
    hidden = pp["hidden"]
    adj_i, s_sum, s_diff = graph_consts
    # sin/cos kept in XLA glue (t-only, [1,H]); its Linear1 matmul + bias is
    # done in-kernel, fused with the first-edge term.
    t_embed = get_sinusoidal_embedding(t, hidden)[None, :]               # [1, H]
    return fused_grapher(
        adj_i, x.astype(_BF16), s_sum, s_diff, t_embed,
        pp["gin"], pp["w1_cand"], pp["w1_ft"], pp["b1"], pp["w2t"], pp["b2"],
    )


def grapher_forward(params, x, edge_index, first_edge, candidate_edges, t):
    """Convenience wrapper matching GraphER.forward.  x:[N,Cin], edge_index:[2,E],
    first_edge:[2], candidate_edges:[C,2], t scalar.  Returns logits [C]."""
    pp = prepare_params(params)
    consts = precompute_graph_constants(x.shape[0], edge_index, first_edge,
                                        candidate_edges)
    return grapher_apply(pp, x, consts, t)


# ----------------------------------------------------------------------------
# Pure-JAX f32 reference (mirrors the PyTorch module) for validation
# ----------------------------------------------------------------------------
def reference_forward(params, x, edge_index, first_edge, candidate_edges, t):
    hidden = params["gin"][0][2].shape[0]
    src, dst = edge_index[0], edge_index[1]
    h = x.astype(_F32)
    for (w1, b1, w2, b2) in params["gin"]:
        agg = jnp.zeros_like(h).at[dst].add(h[src]) + h      # (1+eps)*x + sum, eps=0
        z = jnp.maximum(agg @ w1 + b1, 0.0)
        h = z @ w2 + b2

    def edge_rep(u, v):
        xu, xv = h[u], h[v]
        return jnp.concatenate([xu + xv, jnp.abs(xu - xv)], axis=-1)

    fe = edge_rep(first_edge[0], first_edge[1])
    temb = get_sinusoidal_embedding(t, hidden)
    pw1, pb1, pw2, pb2 = params["edge_pred"]
    logits = []
    for e in range(candidate_edges.shape[0]):
        ef = edge_rep(candidate_edges[e, 0], candidate_edges[e, 1])
        feat = jnp.concatenate([fe, ef, temb], axis=-1)
        score = jnp.maximum(feat @ pw1 + pb1[0], 0.0) @ pw2 + pb2[0]
        logits.append(score[0])
    return jnp.stack(logits)


if __name__ == "__main__":
    key = jax.random.PRNGKey(0)

    # small, deterministic example shapes implied by forward():
    N, IN_CH, HIDDEN, NUM_LAYER = 8, 4, 32, 2
    C = 8  # number of candidate edges (<= 32 in generate())
    T = 3.0

    k_param, k_x = jax.random.split(key)
    params = init_grapher_params(k_param, IN_CH, HIDDEN, NUM_LAYER)
    x = jax.random.normal(k_x, (N, IN_CH), _F32)

    # ring graph, both directions (as PyG undirected edge_index)
    ring = [(i, (i + 1) % N) for i in range(N)]
    edges = ring + [(b, a) for (a, b) in ring]
    edge_index = jnp.array(edges, dtype=jnp.int32).T            # [2, 16]

    first_edge = jnp.array([0, 1], dtype=jnp.int32)              # [2]
    candidate_edges = jnp.array(
        [(2, 3), (4, 5), (6, 7), (2, 5), (3, 6), (4, 7), (2, 7), (3, 5)],
        dtype=jnp.int32,
    )                                                            # [C, 2]

    # hoist graph-dependent constants + parameter prep out of the per-step path
    prepped = prepare_params(params)
    consts = precompute_graph_constants(N, edge_index, first_edge, candidate_edges)
    fwd = jax.jit(functools.partial(grapher_apply, prepped))

    logits = jax.block_until_ready(fwd(x, consts, T))

    # validate against a pure-JAX f32 reference (bf16 MXU tolerance)
    ref = reference_forward(params, x, edge_index, first_edge, candidate_edges, T)

    assert logits.shape == (C,), logits.shape
    assert bool(jnp.all(jnp.isfinite(logits)))
    assert bool(jnp.allclose(logits, ref, rtol=1e-1, atol=1e-1)), (logits, ref)
    print("KERNEL_OK")
</pallas_src>

<mosaic_0001>
module attributes {stable_mosaic.version = 11 : i64} {
  func.func @kernel(%arg0: memref<8x8xbf16, #tpu.memory_space<vmem>>, %arg1: memref<8x4xbf16, #tpu.memory_space<vmem>>, %arg2: memref<9x8xbf16, #tpu.memory_space<vmem>>, %arg3: memref<9x8xbf16, #tpu.memory_space<vmem>>, %arg4: memref<1x32xf32, #tpu.memory_space<vmem>>, %arg5: memref<4x32xbf16, #tpu.memory_space<vmem>>, %arg6: memref<1x32xf32, #tpu.memory_space<vmem>>, %arg7: memref<32x32xbf16, #tpu.memory_space<vmem>>, %arg8: memref<1x32xf32, #tpu.memory_space<vmem>>, %arg9: memref<32x32xbf16, #tpu.memory_space<vmem>>, %arg10: memref<1x32xf32, #tpu.memory_space<vmem>>, %arg11: memref<32x32xbf16, #tpu.memory_space<vmem>>, %arg12: memref<1x32xf32, #tpu.memory_space<vmem>>, %arg13: memref<64x32xbf16, #tpu.memory_space<vmem>>, %arg14: memref<96x32xbf16, #tpu.memory_space<vmem>>, %arg15: memref<1x32xf32, #tpu.memory_space<vmem>>, %arg16: memref<1x32xbf16, #tpu.memory_space<vmem>>, %arg17: memref<1x1xf32, #tpu.memory_space<vmem>>, %arg18: memref<1x8xf32, #tpu.memory_space<vmem>>) attributes {dimension_semantics = [], scalar_prefetch = 0 : i64, scratch_operands = 0 : i64, tpu.core_type = #tpu.core_type<tc>} {
    %c0 = arith.constant 0 : index
    %c0_0 = arith.constant 0 : index
    %0 = vector.load %arg0[%c0, %c0_0] : memref<8x8xbf16, #tpu.memory_space<vmem>>, vector<8x8xbf16>
    %c0_1 = arith.constant 0 : index
    %c0_2 = arith.constant 0 : index
    %1 = vector.load %arg1[%c0_1, %c0_2] : memref<8x4xbf16, #tpu.memory_space<vmem>>, vector<8x4xbf16>
    %c0_3 = arith.constant 0 : index
    %c0_4 = arith.constant 0 : index
    %2 = vector.load %arg5[%c0_3, %c0_4] : memref<4x32xbf16, #tpu.memory_space<vmem>>, vector<4x32xbf16>
    %c0_5 = arith.constant 0 : index
    %c0_6 = arith.constant 0 : index
    %3 = vector.load %arg6[%c0_5, %c0_6] : memref<1x32xf32, #tpu.memory_space<vmem>>, vector<1x32xf32>
    %c0_7 = arith.constant 0 : index
    %c0_8 = arith.constant 0 : index
    %4 = vector.load %arg7[%c0_7, %c0_8] : memref<32x32xbf16, #tpu.memory_space<vmem>>, vector<32x32xbf16>
    %c0_9 = arith.constant 0 : index
    %c0_10 = arith.constant 0 : index
    %5 = vector.load %arg8[%c0_9, %c0_10] : memref<1x32xf32, #tpu.memory_space<vmem>>, vector<1x32xf32>
    %cst = arith.constant dense<0.000000e+00> : vector<8x4xf32>
    %6 = tpu.matmul %0, %1, %cst {dimension_numbers = #tpu.dot_dimension_numbers<[1], [0], [0], [1], [0, 0, 1, 1], [], []>} : vector<8x8xbf16>, vector<8x4xbf16>, vector<8x4xf32> -> vector<8x4xf32>
    %7 = arith.truncf %6 : vector<8x4xf32> to vector<8x4xbf16>
    %cst_11 = arith.constant dense<0.000000e+00> : vector<8x32xf32>
    %8 = tpu.matmul %7, %2, %cst_11 {dimension_numbers = #tpu.dot_dimension_numbers<[1], [0], [0], [1], [0, 0, 1, 1], [], []>} : vector<8x4xbf16>, vector<4x32xbf16>, vector<8x32xf32> -> vector<8x32xf32>
    %9 = vector.broadcast %3 : vector<1x32xf32> to vector<8x32xf32>
    %10 = arith.addf %8, %9 : vector<8x32xf32>
    %cst_12 = arith.constant 0.000000e+00 : f32
    %11 = vector.broadcast %cst_12 : f32 to vector<8x32xf32>
    %12 = arith.maximumf %10, %11 : vector<8x32xf32>
    %13 = arith.truncf %12 : vector<8x32xf32> to vector<8x32xbf16>
    %cst_13 = arith.constant dense<0.000000e+00> : vector<8x32xf32>
    %14 = tpu.matmul %13, %4, %cst_13 {dimension_numbers = #tpu.dot_dimension_numbers<[1], [0], [0], [1], [0, 0, 1, 1], [], []>} : vector<8x32xbf16>, vector<32x32xbf16>, vector<8x32xf32> -> vector<8x32xf32>
    %15 = vector.broadcast %5 : vector<1x32xf32> to vector<8x32xf32>
    %16 = arith.addf %14, %15 : vector<8x32xf32>
    %17 = arith.truncf %16 : vector<8x32xf32> to vector<8x32xbf16>
    %c0_14 = arith.constant 0 : index
    %c0_15 = arith.constant 0 : index
    %18 = vector.load %arg9[%c0_14, %c0_15] : memref<32x32xbf16, #tpu.memory_space<vmem>>, vector<32x32xbf16>
    %c0_16 = arith.constant 0 : index
    %c0_17 = arith.constant 0 : index
    %19 = vector.load %arg10[%c0_16, %c0_17] : memref<1x32xf32, #tpu.memory_space<vmem>>, vector<1x32xf32>
    %c0_18 = arith.constant 0 : index
    %c0_19 = arith.constant 0 : index
    %20 = vector.load %arg11[%c0_18, %c0_19] : memref<32x32xbf16, #tpu.memory_space<vmem>>, vector<32x32xbf16>
    %c0_20 = arith.constant 0 : index
    %c0_21 = arith.constant 0 : index
    %21 = vector.load %arg12[%c0_20, %c0_21] : memref<1x32xf32, #tpu.memory_space<vmem>>, vector<1x32xf32>
    %cst_22 = arith.constant dense<0.000000e+00> : vector<8x32xf32>
    %22 = tpu.matmul %0, %17, %cst_22 {dimension_numbers = #tpu.dot_dimension_numbers<[1], [0], [0], [1], [0, 0, 1, 1], [], []>} : vector<8x8xbf16>, vector<8x32xbf16>, vector<8x32xf32> -> vector<8x32xf32>
    %23 = arith.truncf %22 : vector<8x32xf32> to vector<8x32xbf16>
    %cst_23 = arith.constant dense<0.000000e+00> : vector<8x32xf32>
    %24 = tpu.matmul %23, %18, %cst_23 {dimension_numbers = #tpu.dot_dimension_numbers<[1], [0], [0], [1], [0, 0, 1, 1], [], []>} : vector<8x32xbf16>, vector<32x32xbf16>, vector<8x32xf32> -> vector<8x32xf32>
    %25 = vector.broadcast %19 : vector<1x32xf32> to vector<8x32xf32>
    %26 = arith.addf %24, %25 : vector<8x32xf32>
    %cst_24 = arith.constant 0.000000e+00 : f32
    %27 = vector.broadcast %cst_24 : f32 to vector<8x32xf32>
    %28 = arith.maximumf %26, %27 : vector<8x32xf32>
    %29 = arith.truncf %28 : vector<8x32xf32> to vector<8x32xbf16>
    %cst_25 = arith.constant dense<0.000000e+00> : vector<8x32xf32>
    %30 = tpu.matmul %29, %20, %cst_25 {dimension_numbers = #tpu.dot_dimension_numbers<[1], [0], [0], [1], [0, 0, 1, 1], [], []>} : vector<8x32xbf16>, vector<32x32xbf16>, vector<8x32xf32> -> vector<8x32xf32>
    %31 = vector.broadcast %21 : vector<1x32xf32> to vector<8x32xf32>
    %32 = arith.addf %30, %31 : vector<8x32xf32>
    %33 = arith.truncf %32 : vector<8x32xf32> to vector<8x32xbf16>
    %c0_26 = arith.constant 0 : index
    %c0_27 = arith.constant 0 : index
    %34 = vector.load %arg2[%c0_26, %c0_27] : memref<9x8xbf16, #tpu.memory_space<vmem>>, vector<9x8xbf16>
    %cst_28 = arith.constant dense<0.000000e+00> : vector<9x32xf32>
    %35 = tpu.matmul %34, %33, %cst_28 {dimension_numbers = #tpu.dot_dimension_numbers<[1], [0], [0], [1], [0, 0, 1, 1], [], []>} : vector<9x8xbf16>, vector<8x32xbf16>, vector<9x32xf32> -> vector<9x32xf32>
    %c0_29 = arith.constant 0 : index
    %c0_30 = arith.constant 0 : index
    %36 = vector.load %arg3[%c0_29, %c0_30] : memref<9x8xbf16, #tpu.memory_space<vmem>>, vector<9x8xbf16>
    %cst_31 = arith.constant dense<0.000000e+00> : vector<9x32xf32>
    %37 = tpu.matmul %36, %33, %cst_31 {dimension_numbers = #tpu.dot_dimension_numbers<[1], [0], [0], [1], [0, 0, 1, 1], [], []>} : vector<9x8xbf16>, vector<8x32xbf16>, vector<9x32xf32> -> vector<9x32xf32>
    %38 = math.absf %37 : vector<9x32xf32>
    %39 = vector.extract_strided_slice %35 {offsets = [0, 0], sizes = [8, 32], strides = [1, 1]} : vector<9x32xf32> to vector<8x32xf32>
    %40 = arith.truncf %39 : vector<8x32xf32> to vector<8x32xbf16>
    %41 = vector.extract_strided_slice %38 {offsets = [0, 0], sizes = [8, 32], strides = [1, 1]} : vector<9x32xf32> to vector<8x32xf32>
    %42 = arith.truncf %41 : vector<8x32xf32> to vector<8x32xbf16>
    %43 = vector.extract_strided_slice %35 {offsets = [8, 0], sizes = [1, 32], strides = [1, 1]} : vector<9x32xf32> to vector<1x32xf32>
    %44 = arith.truncf %43 : vector<1x32xf32> to vector<1x32xbf16>
    %45 = vector.extract_strided_slice %38 {offsets = [8, 0], sizes = [1, 32], strides = [1, 1]} : vector<9x32xf32> to vector<1x32xf32>
    %46 = arith.truncf %45 : vector<1x32xf32> to vector<1x32xbf16>
    %c0_32 = arith.constant 0 : index
    %c0_33 = arith.constant 0 : index
    %47 = vector.load %arg4[%c0_32, %c0_33] : memref<1x32xf32, #tpu.memory_space<vmem>>, vector<1x32xf32>
    %48 = arith.truncf %47 : vector<1x32xf32> to vector<1x32xbf16>
    %49 = tpu.concatenate %44, %46, %48 in 1 : vector<1x32xbf16>, vector<1x32xbf16>, vector<1x32xbf16> -> vector<1x96xbf16>
    %c0_34 = arith.constant 0 : index
    %c0_35 = arith.constant 0 : index
    %50 = vector.load %arg14[%c0_34, %c0_35] : memref<96x32xbf16, #tpu.memory_space<vmem>>, vector<96x32xbf16>
    %cst_36 = arith.constant dense<0.000000e+00> : vector<1x32xf32>
    %51 = tpu.matmul %49, %50, %cst_36 {dimension_numbers = #tpu.dot_dimension_numbers<[1], [0], [0], [1], [0, 0, 1, 1], [], []>} : vector<1x96xbf16>, vector<96x32xbf16>, vector<1x32xf32> -> vector<1x32xf32>
    %c0_37 = arith.constant 0 : index
    %c0_38 = arith.constant 0 : index
    %52 = vector.load %arg15[%c0_37, %c0_38] : memref<1x32xf32, #tpu.memory_space<vmem>>, vector<1x32xf32>
    %53 = arith.addf %51, %52 : vector<1x32xf32>
    %54 = tpu.concatenate %40, %42 in 1 : vector<8x32xbf16>, vector<8x32xbf16> -> vector<8x64xbf16>
    %c0_39 = arith.constant 0 : index
    %c0_40 = arith.constant 0 : index
    %55 = vector.load %arg13[%c0_39, %c0_40] : memref<64x32xbf16, #tpu.memory_space<vmem>>, vector<64x32xbf16>
    %cst_41 = arith.constant dense<0.000000e+00> : vector<8x32xf32>
    %56 = tpu.matmul %54, %55, %cst_41 {dimension_numbers = #tpu.dot_dimension_numbers<[1], [0], [0], [1], [0, 0, 1, 1], [], []>} : vector<8x64xbf16>, vector<64x32xbf16>, vector<8x32xf32> -> vector<8x32xf32>
    %57 = vector.broadcast %53 : vector<1x32xf32> to vector<8x32xf32>
    %58 = arith.addf %56, %57 : vector<8x32xf32>
    %cst_42 = arith.constant 0.000000e+00 : f32
    %59 = vector.broadcast %cst_42 : f32 to vector<8x32xf32>
    %60 = arith.maximumf %58, %59 : vector<8x32xf32>
    %c0_43 = arith.constant 0 : index
    %c0_44 = arith.constant 0 : index
    %61 = vector.load %arg16[%c0_43, %c0_44] : memref<1x32xbf16, #tpu.memory_space<vmem>>, vector<1x32xbf16>
    %62 = arith.truncf %60 : vector<8x32xf32> to vector<8x32xbf16>
    %cst_45 = arith.constant dense<0.000000e+00> : vector<1x8xf32>
    %63 = tpu.matmul %61, %62, %cst_45 {dimension_numbers = #tpu.dot_dimension_numbers<[1], [1], [0], [0], [0, 0, 1, 0], [], []>} : vector<1x32xbf16>, vector<8x32xbf16>, vector<1x8xf32> -> vector<1x8xf32>
    %c0_46 = arith.constant 0 : index
    %c0_47 = arith.constant 0 : index
    %64 = vector.load %arg17[%c0_46, %c0_47] : memref<1x1xf32, #tpu.memory_space<vmem>>, vector<1x1xf32>
    %65 = vector.broadcast %64 : vector<1x1xf32> to vector<1x8xf32>
    %66 = arith.addf %63, %65 : vector<1x8xf32>
    %c0_48 = arith.constant 0 : index
    %c0_49 = arith.constant 0 : index
    %67 = vector.load %arg18[%c0_48, %c0_49] : memref<1x8xf32, #tpu.memory_space<vmem>>, vector<1x8xf32>
    tpu.vector_store %arg18[%c0_48, %c0_49], %66 {strides = array<i32>} : memref<1x8xf32, #tpu.memory_space<vmem>>, vector<1x8xf32>,
    return
  }
}

</mosaic_0001>

<bundles_post_ra>
// kernel: grapher_apply.1
= control target key start
LH: loop header
LB: loop body
LE: loop exit
PB: predicated region body
PF: predicated region fallthrough
CT: control target
= control target key end

     0   :  { %s1533_s0 = inlined_call_operand.vmem [shape: bf16[8,8], index: 0, kind: input, shape index: {}]   ;;  %s1534_s1 = inlined_call_operand.vmem [shape: bf16[8,4], index: 1, kind: input, shape index: {}]   ;;  %s1535_s2 = inlined_call_operand.vmem [shape: bf16[9,8], index: 2, kind: input, shape index: {}]   ;;  %s1536_s3 = inlined_call_operand.vmem [shape: bf16[9,8], index: 3, kind: input, shape index: {}]   ;;  %s1537_s4 = inlined_call_operand.vmem [shape: f32[1,32], index: 4, kind: input, shape index: {}]   ;;  %s1538_s5 = inlined_call_operand.hbm [shape: bf16[4,32], index: 5, kind: input, shape index: {}]   ;;  %s1539_s6 = inlined_call_operand.hbm [shape: f32[1,32], index: 6, kind: input, shape index: {}]   ;;  %s1540_s7 = inlined_call_operand.hbm [shape: bf16[32,32], index: 7, kind: input, shape index: {}]   ;;  %s1541_s8 = inlined_call_operand.hbm [shape: f32[1,32], index: 8, kind: input, shape index: {}]   ;;  %s1542_s9 = inlined_call_operand.hbm [shape: bf16[32,32], index: 9, kind: input, shape index: {}]   ;;  %s1543_s10 = inlined_call_operand.hbm [shape: f32[1,32], index: 10, kind: input, shape index: {}]   ;;  %s1544_s11 = inlined_call_operand.vmem [shape: bf16[32,32], index: 11, kind: input, shape index: {}]   ;;  %s1545_s12 = inlined_call_operand.hbm [shape: f32[1,32], index: 12, kind: input, shape index: {}]   ;;  %s1546_s13 = inlined_call_operand.hbm [shape: bf16[64,32], index: 13, kind: input, shape index: {}]   ;;  %s1547_s14 = inlined_call_operand.vmem [shape: bf16[96,32], index: 14, kind: input, shape index: {}]   ;;  %s1548_s15 = inlined_call_operand.vmem [shape: f32[1,32], index: 15, kind: input, shape index: {}]   ;;  %s1549_s16 = inlined_call_operand.vmem [shape: bf16[1,32], index: 16, kind: input, shape index: {}]   ;;  %s1550_s17 = inlined_call_operand.<no memory space> [shape: f32[1,1], index: 17, kind: input, shape index: {}]   ;;  %s1551_s18 = inlined_call_operand.hbm [shape: f32[1,8], index: 18, kind: output, shape index: {}]  }
   0x1   :  { %1552 = sst [smem:[#allocation24_spill]] %s1533_s0  ;;  %v23_v0 = vstv %s1550_s17 }
   0x2   :  { %1553 = sst [smem:[#allocation25_spill]] %s1534_s1  ;;  %24 = vst [vmem:[#allocation2] sm:$0x1] %v23_v0 }
   0x3   :  { %1554 = sst [smem:[#allocation26_spill]] %s1535_s2 }
   0x4   :  { %25 = vsyncpa [#allocation4], 0 }
   0x5   :  { %26 = vsyncpa [#allocation7], 0 }
   0x6   :  { %27 = vsyncpa [#allocation10], 0 }
   0x7   :  { %28 = vsyncpa [#allocation13], 0 }
   0x8   :  { %29 = vsyncpa [#allocation16], 0 }
   0x9   :  { %30 = vsyncpa [#allocation5], 0  ;;  %s1280_s29 = smov [#allocation6]   ;;  %s1281_s0 = smov [#allocation9]  }
   0xa   :  { %s57_s30 = sshll.u32 %s1280_s29, 4  ;;  %s79_s19 = sshll.u32 %s1281_s0, 4  ;;  %s58_s30 = int_to_ptr.vmem [resolvable:$true] %s57_s30  ;;  %s80_s19 = int_to_ptr.vmem [resolvable:$true] %s79_s19 }
   0xb   :  { %s1096_s1 = scalar_lea.vmem %s58_s30, 16  ;;  %s1100_s20 = scalar_lea.vmem %s58_s30, 32 }
   0xc   :  { %p1097_p0 = scmp.ne.s32.totalorder %s58_s30, %s1096_s1  ;;  %p1101_p1 = scmp.lt.s32.totalorder %s58_s30, %s58_s30 }
   0xd   :  { %p1102_p2 = scmp.lt.s32.totalorder %s1100_s20, %s1096_s1 }
   0xf   :  { %p1103_p3 = por %p1102_p2, %p1101_p1 }
  0x11   :  { %p1104_p4 = pnand %p1103_p3, %p1097_p0 }
  0x13   :  { %1107 = shalt.err (!%p1104_p4)
}
  0x14   :  { %60 = dma.hbm_to_vmem [thread:$0]  %s1539_s6, 16, %s58_s30, [#allocation7]  }
  0x15   :  { %s1116_s22 = scalar_lea.vmem %s80_s19, 16  ;;  %s1120_s2 = scalar_lea.vmem %s80_s19, 32 }
  0x16   :  { %p1117_p5 = scmp.ne.s32.totalorder %s80_s19, %s1116_s22  ;;  %p1121_p6 = scmp.lt.s32.totalorder %s80_s19, %s80_s19 }
  0x17   :  { %p1122_p7 = scmp.lt.s32.totalorder %s1120_s2, %s1116_s22 }
  0x19   :  { %p1123_p8 = por %p1122_p7, %p1121_p6 }
  0x1b   :  { %p1124_p9 = pnand %p1123_p8, %p1117_p5 }
  0x1d   :  { %1127 = shalt.err (!%p1124_p9)
}
  0x1e   :  { %82 = dma.hbm_to_vmem [thread:$0]  %s1541_s8, 16, %s80_s19, [#allocation10]  }
  0x1f   :  { %s1282_s25 = smov [#allocation12]   ;;  %s1283_s27 = smov [#allocation3]  }
  0x20   :  { %s101_s26 = sshll.u32 %s1282_s25, 4  ;;  %s47_s28 = sshll.u32 %s1283_s27, 4  ;;  %s102_s26 = int_to_ptr.vmem [resolvable:$true] %s101_s26  ;;  %s48_s28 = int_to_ptr.vmem [resolvable:$true] %s47_s28 }
  0x21   :  { %s1136_s29 = scalar_lea.vmem %s102_s26, 16  ;;  %s1140_s6 = scalar_lea.vmem %s102_s26, 32 }
  0x22   :  { %p1137_p10 = scmp.ne.s32.totalorder %s102_s26, %s1136_s29  ;;  %p1141_p11 = scmp.lt.s32.totalorder %s102_s26, %s102_s26 }
  0x23   :  { %p1142_p12 = scmp.lt.s32.totalorder %s1140_s6, %s1136_s29 }
  0x25   :  { %p1143_p13 = por %p1142_p12, %p1141_p11 }
  0x27   :  { %p1144_p0 = pnand %p1143_p13, %p1137_p10 }
  0x29   :  { %1147 = shalt.err (!%p1144_p0)
}
  0x2a   :  { %104 = dma.hbm_to_vmem [thread:$0]  %s1543_s10, 16, %s102_s26, [#allocation13]  }
  0x2b   :  { %s1156_s1 = scalar_lea.vmem %s48_s28, 32  ;;  %p1161_p2 = scmp.lt.s32.totalorder %s48_s28, %s48_s28 }
  0x2c   :  { %p1157_p1 = scmp.ne.s32.totalorder %s48_s28, %s1156_s1  ;;  %p1162_p3 = scmp.lt.s32.totalorder %s1156_s1, %s1156_s1 }
  0x2e   :  { %p1163_p4 = por %p1162_p3, %p1161_p2 }
  0x30   :  { %p1164_p5 = pnand %p1163_p4, %p1157_p1 }
  0x32   :  { %1167 = shalt.err (!%p1164_p5)
}
  0x33   :  { %50 = dma.hbm_to_vmem [thread:$0]  %s1538_s5, 32, %s48_s28, [#allocation4]  }
  0x34   :  { %s1284_s20 = smov [#allocation8]  }
  0x35   :  { %s66_s17 = sshll.u32 %s1284_s20, 4  ;;  %s67_s17 = int_to_ptr.vmem [resolvable:$true] %s66_s17 }
  0x36   :  { %s1176_s21 = scalar_lea.vmem %s67_s17, 256  ;;  %p1181_p7 = scmp.lt.s32.totalorder %s67_s17, %s67_s17 }
  0x37   :  { %p1177_p6 = scmp.ne.s32.totalorder %s67_s17, %s1176_s21  ;;  %p1182_p8 = scmp.lt.s32.totalorder %s1176_s21, %s1176_s21 }
  0x39   :  { %p1183_p9 = por %p1182_p8, %p1181_p7 }
  0x3b   :  { %p1184_p10 = pnand %p1183_p9, %p1177_p6 }
  0x3d   :  { %1187 = shalt.err (!%p1184_p10)
}
  0x3e   :  { %s1285_s10 = smov 64   ;;  %s1286_s22 = smov 4  }
  0x3f   :  { %72 = dma.hbm_to_vmem [thread:$0]  %s1540_s7, 256, %s67_s17, [#allocation7], %s1285_s10, %s1285_s10, %s1286_s22  }
  0x40   :  { %s1287_s5 = smov [#allocation11]   ;;  %s1288_s25 = smov [#allocation14]  }
  0x41   :  { %s88_s24 = sshll.u32 %s1287_s5, 4  ;;  %s113_s26 = sshll.u32 %s1288_s25, 4  ;;  %s89_s24 = int_to_ptr.vmem [resolvable:$true] %s88_s24  ;;  %s114_s26 = int_to_ptr.vmem [resolvable:$true] %s113_s26 }
  0x42   :  { %s1196_s27 = scalar_lea.vmem %s89_s24, 256  ;;  %p1201_p12 = scmp.lt.s32.totalorder %s89_s24, %s89_s24 }
  0x43   :  { %p1197_p11 = scmp.ne.s32.totalorder %s89_s24, %s1196_s27  ;;  %p1202_p13 = scmp.lt.s32.totalorder %s1196_s27, %s1196_s27 }
  0x45   :  { %p1203_p0 = por %p1202_p13, %p1201_p12 }
  0x47   :  { %p1204_p1 = pnand %p1203_p0, %p1197_p11 }
  0x49   :  { %1207 = shalt.err (!%p1204_p1)
}
  0x4a   :  { %94 = dma.hbm_to_vmem [thread:$0]  %s1542_s9, 256, %s89_s24, [#allocation10], %s1285_s10, %s1285_s10, %s1286_s22  }
  0x4b   :  { %s1216_s7 = scalar_lea.vmem %s114_s26, 16  ;;  %s1220_s6 = scalar_lea.vmem %s114_s26, 32 }
  0x4c   :  { %p1217_p2 = scmp.ne.s32.totalorder %s114_s26, %s1216_s7  ;;  %p1221_p3 = scmp.lt.s32.totalorder %s114_s26, %s114_s26 }
  0x4d   :  { %p1222_p4 = scmp.lt.s32.totalorder %s1220_s6, %s1216_s7 }
  0x4f   :  { %p1223_p5 = por %p1222_p4, %p1221_p3 }
  0x51   :  { %p1224_p6 = pnand %p1223_p5, %p1217_p2 }
  0x53   :  { %1227 = shalt.err (!%p1224_p6)
}
  0x54   :  { %116 = dma.hbm_to_vmem [thread:$0]  %s1545_s12, 16, %s114_s26, [#allocation13]  }
  0x55   :  { %s1289_s1 = smov [#allocation15]  }
  0x56   :  { %s122_s8 = sshll.u32 %s1289_s1, 4  ;;  %s123_s8 = int_to_ptr.vmem [resolvable:$true] %s122_s8 }
  0x57   :  { %s1236_s19 = scalar_lea.vmem %s123_s8, 512  ;;  %p1241_p8 = scmp.lt.s32.totalorder %s123_s8, %s123_s8 }
  0x58   :  { %p1237_p7 = scmp.ne.s32.totalorder %s123_s8, %s1236_s19  ;;  %p1242_p9 = scmp.lt.s32.totalorder %s1236_s19, %s1236_s19 }
  0x5a   :  { %p1243_p10 = por %p1242_p9, %p1241_p8 }
  0x5c   :  { %p1244_p11 = pnand %p1243_p10, %p1237_p7 }
  0x5e   :  { %1247 = shalt.err (!%p1244_p11)
}
  0x5f   :  { %128 = dma.hbm_to_vmem [thread:$0]  %s1546_s13, 512, %s123_s8, [#allocation16], %s1285_s10, %s1285_s10, %s1286_s22  }
  0x60   :  { %1268 = dma.done.wait [#allocation4], 32  }
  0x61   :  { %1269 = vsyncadd [#allocation4], 4294967264 }
  0x62   :  { %1270 = dma.done.wait [#allocation7], 272  }
  0x63   :  { %1271 = vsyncadd [#allocation7], 4294967024 }
  0x64   :  { %1272 = dma.done.wait [#allocation10], 272  }
  0x65   :  { %1273 = vsyncadd [#allocation10], 4294967024 }
  0x66   :  { %1274 = dma.done.wait [#allocation13], 32  }
  0x67   :  { %1275 = vsyncadd [#allocation13], 4294967264 }
  0x68   :  { %1276 = dma.done.wait [#allocation16], 512  }
  0x69   :  { %1277 = vsyncadd [#allocation16], 4294966784  ;;  %v1290_v1 = vmov 0.0   ;;  %vm1291_vm0 = vmmov 0   ;;  %vm175_vm1 = vcmask 1043456   ;;  %s1555_s17 = sld [smem:[#allocation25_spill]] }
  0x6a   :  { %965 = vmatprep.subr.bf16.mxu0 %v1290_v1  ;;  %967 = vmatprep.mubr.msk.bf16.mxu0 %vm1291_vm0, %v1290_v1  ;;  %s1556_s2 = sld [smem:[#allocation24_spill]]  ;;  %vm171_vm2 = vcmask 64512   ;;  %v164_v5 = vld [vmem:[#allocation3] sm:$0x3]  ;;  %vm230_vm3 = vcmask 1041408   ;;  %vm226_vm4 = vcmask 31744  }
  0x6b   :  { %971 = vmatprep.subr.bf16.mxu1 %v1290_v1  ;;  %973 = vmatprep.mubr.msk.bf16.mxu1 %vm1291_vm0, %v1290_v1  ;;  %v232_v6 = vsel %vm230_vm3, %v164_v5, 0  ;;  %v1070_v12 = vld [vmem:[#allocation8 + $0x8] sm:$0xff]   ;;  %v1071_v13 = vld [vmem:[#allocation8] sm:$0xff]   ;;  %v900_v14 = vld [vmem:[#allocation6] ss:$0 sm:$0xff]  ;;  %vm294_vm5 = vcmask 261120  }
  0x6c   :  { %972 = vmatpush3.bf16.msra.mxu1 %v232_v6  ;;  %v1072_v22 = vld [vmem:[#allocation11 + $0x8] sm:$0xff]   ;;  %v902_v23 = vld [vmem:[#allocation9] ss:$0 sm:$0xff]  ;;  %v1073_v31 = vld [vmem:[#allocation11] sm:$0xff]   ;;  %s1557_s29 = sld [smem:[#allocation26_spill]]  ;;  %vm640_vm6 = vcmask 523264  }
  0x6d   :  { %985 = vmatprep.subr.bf16.mxu1 %v1290_v1  ;;  %v1074_v37 = vld [vmem:[%s1544_s11 + $0x8] sm:$0xff]   ;;  %v1075_v38 = vld [vmem:[%s1544_s11] sm:$0xff]   ;;  %v1082_v61 = vld [vmem:[%s1547_s14 + $0x18] sm:$0xff]   ;;  %vm692_vm7 = vcmask 785408   ;;  %vm878_vm8 = vcmask 57344  }
  0x6e   :  { %v907_v39 = vld [vmem:[#allocation12] ss:$0 sm:$0xff]  ;;  %v911_v47 = vld [vmem:[#allocation14] ss:$0 sm:$0xff]  ;;  %v1076_v54 = vld [vmem:[%s1536_s3] sm:$0x1f]  }
  0x6f   :  { %v163_v2 = vld [vmem:[%s1555_s17] sm:$0xf]  ;;  %v1078_v57 = vld [vmem:[%s1547_s14 + $0x28] sm:$0xff]   ;;  %v1083_v62 = vld [vmem:[#allocation15 + $0x8] sm:$0xff]   ;;  %s1292_s17 = smov 32  }
  0x70   :  { %v162_v3 = vld [vmem:[%s1556_s2] sm:$0xf]  ;;  %v177_v4 = vsel %vm175_vm1, %v163_v2, 0  ;;  %v1084_v63 = vld [vmem:[%s1547_s14 + $0x10] sm:$0xff]   ;;  %v1086_v2 = vld [vmem:[%s1547_s14 + $0x8] sm:$0xff]  }
  0x71   :  { %966 = vmatpush3.bf16.msra.mxu0 %v177_v4  ;;  %v1079_v58 = vld [vmem:[#allocation15 + $0x18] sm:$0xff]   ;;  %v1081_v60 = vld [vmem:[#allocation15 + $0x10] sm:$0xff]   ;;  %v1085_v0 = vld [vmem:[#allocation15] sm:$0xff]  }
  0x72   :  { %977 = vmatprep.subr.bf16.mxu0 %v1290_v1  ;;  %v1077_v55 = vld [vmem:[%s1557_s29] sm:$0x1f]  }
  0x73   :  { %v1080_v59 = vld [vmem:[%s1547_s14 + $0x20] sm:$0xff]  }
  0x74   :  { %968 = vmatmul.mubr.msk.bf16.vlgmr.msra.gmra.mxu0 %vm171_vm2, %v162_v3 }
  0x75   :  { %981 = vmatprep.mubr.msk.bf16.mxu0 %vm1291_vm0, %v1290_v1  ;;  %978 = vmatpush3.bf16.msra.mxu0 %v1070_v12 }
  0x76   :  { %979 = vmatprep.subr.bf16.mxu0 %v1290_v1 }
  0x79   :  { %980 = vmatpush3.bf16.msra.mxu0 %v1071_v13 }
  0x7a   :  { %991 = vmatprep.subr.bf16.mxu0 %v1290_v1 }
 0x134   :  { %v213_v7 = vpop.f32.mrf.mxu0 }
 0x135   :  { %v219_v8 = vpack.c.bf16 %v213_v7, %v213_v7 }
 0x136   :  { %v969_v9 = vpop.f32.mrf.mxu0 }
 0x137   :  { %974 = vmatmul.mubr.msk.bf16.vlgmr.msra.gmra.mxu1 %vm226_vm4, %v219_v8 }
 0x138   :  { %v216_v10 = vpop.f32.mrf.mxu0  ;;  %987 = vmatprep.mubr.msk.bf16.mxu1 %vm1291_vm0, %v1290_v1 }
 0x13a   :  { %v970_v11 = vpop.f32.mrf.mxu0 }
 0x1f7   :  { %v268_v15 = vpop.f32.mrf.mxu1 }
 0x1f8   :  { %v269_v16 = vadd.f32 %v900_v14, %v268_v15  ;;  %v629_v14 = vld [vmem:[%s1537_s4] sm:$0x1] }
 0x1f9   :  { %v975_v17 = vpop.f32.mrf.mxu1 }
 0x1fa   :  { %v274_v18 = vmax.f32 %v269_v16, 0.0  ;;  %v630_v17 = vpack.c.bf16 %v629_v14, %v629_v14 }
 0x1fb   :  { %v271_v19 = vpop.f32.mrf.mxu1 }
 0x1fc   :  { %v275_v20 = vpack.c.bf16 %v274_v18, %v274_v18 }
 0x1fd   :  { %v976_v21 = vpop.f32.mrf.mxu1 }
 0x1fe   :  { %982 = vmatmul.mubr.msk.bf16.vlgmr.msra.gmra.mxu0 %vm294_vm5, %v275_v20 }
 0x1ff   :  { %995 = vmatprep.mubr.msk.bf16.mxu0 %vm1291_vm0, %v1290_v1  ;;  %992 = vmatpush3.bf16.msra.mxu0 %v1072_v22 }
 0x200   :  { %993 = vmatprep.subr.bf16.mxu0 %v1290_v1 }
 0x203   :  { %994 = vmatpush3.bf16.msra.mxu0 %v1073_v31 }
 0x204   :  { %1007 = vmatprep.subr.bf16.mxu0 %v1290_v1 }
 0x2be   :  { %v332_v24 = vpop.f32.mrf.mxu0 }
 0x2bf   :  { %v333_v25 = vadd.f32 %v902_v23, %v332_v24 }
 0x2c0   :  { %v983_v26 = vpop.f32.mrf.mxu0 }
 0x2c1   :  { %v338_v27 = vpack.c.bf16 %v333_v25, %v333_v25  ;;  %v822_v26 = vld [vmem:[#allocation2] sm:$0x1] }
 0x2c2   :  { %v335_v28 = vpop.f32.mrf.mxu0 }
 0x2c3   :  { %v350_v29 = vsel %vm175_vm1, %v338_v27, 0  ;;  %v1293_v27 = vmov 0   ;;  %v749_v28 = vlaneseq }
 0x2c4   :  { %v984_v30 = vpop.f32.mrf.mxu0  ;;  %986 = vmatpush3.bf16.msra.mxu1 %v350_v29  ;;  %1068 = vset.pattern.permute.xlu1 %v1293_v27 }
 0x2c5   :  { %999 = vmatprep.subr.bf16.mxu1 %v1290_v1  ;;  %1069 = vset.pattern.permute.xlu0 %v1293_v27  ;;  %v750_v31 = vshrl.u32 %v749_v28, 7 }
 0x2c7   :  { %988 = vmatmul.mubr.msk.bf16.vlgmr.msra.gmra.mxu1 %vm171_vm2, %v162_v3  ;;  %v1087_v3 = vld [vmem:[%s1547_s14] sm:$0xff]  }
 0x2c8   :  { %1003 = vmatprep.mubr.msk.bf16.mxu1 %vm1291_vm0, %v1290_v1  ;;  %1000 = vmatpush3.bf16.msra.mxu1 %v1074_v37 }
 0x2c9   :  { %1001 = vmatprep.subr.bf16.mxu1 %v1290_v1 }
 0x2cc   :  { %1002 = vmatpush3.bf16.msra.mxu1 %v1075_v38 }
 0x2cd   :  { %1013 = vmatprep.subr.bf16.mxu1 %v1290_v1 }
 0x387   :  { %v386_v32 = vpop.f32.mrf.mxu1 }
 0x388   :  { %v392_v33 = vpack.c.bf16 %v386_v32, %v386_v32 }
 0x389   :  { %v989_v34 = vpop.f32.mrf.mxu1 }
 0x38a   :  { %996 = vmatmul.mubr.msk.bf16.vlgmr.msra.gmra.mxu0 %vm294_vm5, %v392_v33  ;;  %v751_v34 = vsub.s32 0, %v750_v31 }
 0x38b   :  { %v389_v35 = vpop.f32.mrf.mxu1  ;;  %1009 = vmatprep.mubr.msk.bf16.mxu0 %vm1291_vm0, %v1290_v1 }
 0x38d   :  { %v990_v36 = vpop.f32.mrf.mxu1 }
 0x44a   :  { %v448_v40 = vpop.f32.mrf.mxu0 }
 0x44b   :  { %v449_v41 = vadd.f32 %v907_v39, %v448_v40 }
 0x44c   :  { %v997_v42 = vpop.f32.mrf.mxu0 }
 0x44d   :  { %v454_v43 = vmax.f32 %v449_v41, 0.0 }
 0x44e   :  { %v451_v44 = vpop.f32.mrf.mxu0 }
 0x44f   :  { %v455_v45 = vpack.c.bf16 %v454_v43, %v454_v43 }
 0x450   :  { %v998_v46 = vpop.f32.mrf.mxu0 }
 0x451   :  { %1004 = vmatmul.mubr.msk.bf16.vlgmr.msra.gmra.mxu1 %vm294_vm5, %v455_v45  ;;  %v820_v45 = vld [vmem:[%s1549_s16] sm:$0x1] }
 0x452   :  { %1015 = vmatprep.mubr.msk.bf16.mxu1 %vm1291_vm0, %v1290_v1 }
 0x511   :  { %v511_v48 = vpop.f32.mrf.mxu1 }
 0x512   :  { %v512_v49 = vadd.f32 %v911_v47, %v511_v48 }
 0x513   :  { %v1005_v50 = vpop.f32.mrf.mxu1 }
 0x514   :  { %v517_v51 = vpack.c.bf16 %v512_v49, %v512_v49 }
 0x515   :  { %v514_v52 = vpop.f32.mrf.mxu1 }
 0x516   :  { %v529_v53 = vsel %vm175_vm1, %v517_v51, 0 }
 0x517   :  { %v1006_v56 = vpop.f32.mrf.mxu1  ;;  %1008 = vmatpush3.bf16.msra.mxu0 %v529_v53  ;;  %1014 = vmatpush3.bf16.msra.mxu1 %v529_v53 }
 0x518   :  { %1019 = vmatprep.subr.bf16.mxu0 %v1290_v1  ;;  %1035 = vmatprep.subr.bf16.mxu1 %v1290_v1 }
 0x51a   :  { %1016 = vmatmul.mubr.msk.bf16.vlgmr.msra.gmra.mxu1 %vm171_vm2, %v1076_v54  ;;  %1010 = vmatmul.mubr.msk.bf16.vlgmr.msra.gmra.mxu0 %vm171_vm2, %v1077_v55 }
 0x51b   :  { %1043 = vmatprep.mubr.msk.bf16.mxu1 %vm1291_vm0, %v1290_v1  ;;  %1031 = vmatprep.mubr.msk.bf16.mxu0 %vm1291_vm0, %v1290_v1 }
 0x51c   :  { %1020 = vmatpush3.bf16.msra.mxu0 %v1078_v57  ;;  %1036 = vmatpush3.bf16.msra.mxu1 %v1079_v58 }
 0x51d   :  { %1021 = vmatprep.subr.bf16.mxu0 %v1290_v1  ;;  %1037 = vmatprep.subr.bf16.mxu1 %v1290_v1 }
 0x520   :  { %1022 = vmatpush3.bf16.msra.mxu0 %v1080_v59  ;;  %1038 = vmatpush3.bf16.msra.mxu1 %v1081_v60 }
 0x521   :  { %1023 = vmatprep.subr.bf16.mxu0 %v1290_v1  ;;  %1039 = vmatprep.subr.bf16.mxu1 %v1290_v1 }
 0x524   :  { %1024 = vmatpush3.bf16.msra.mxu0 %v1082_v61  ;;  %1040 = vmatpush3.bf16.msra.mxu1 %v1083_v62 }
 0x525   :  { %1025 = vmatprep.subr.bf16.mxu0 %v1290_v1  ;;  %1041 = vmatprep.subr.bf16.mxu1 %v1290_v1 }
 0x528   :  { %1026 = vmatpush3.bf16.msra.mxu0 %v1084_v63  ;;  %1042 = vmatpush3.bf16.msra.mxu1 %v1085_v0 }
 0x529   :  { %1027 = vmatprep.subr.bf16.mxu0 %v1290_v1  ;;  %1047 = vmatprep.subr.bf16.mxu1 %v1290_v1 }
 0x52c   :  { %1028 = vmatpush3.bf16.msra.mxu0 %v1086_v2 }
 0x52d   :  { %1029 = vmatprep.subr.bf16.mxu0 %v1290_v1 }
 0x530   :  { %1030 = vmatpush3.bf16.msra.mxu0 %v1087_v3 }
 0x5da   :  { %v616_v4 = vpop.f32.mrf.mxu1  ;;  %v565_v5 = vpop.f32.mrf.mxu0 }
 0x5db   :  { %v623_v6 = vand.u32 2147483647, %v616_v4  ;;  %v625_v18 = vpack.c.bf16 %v565_v5, %v565_v5 }
 0x5dc   :  { %v1017_v7 = vpop.f32.mrf.mxu1  ;;  %v1011_v8 = vpop.f32.mrf.mxu0 }
 0x5dd   :  { %v626_v9 = vpack.c.bf16 %v623_v6, %v623_v6 }
 0x5de   :  { %v619_v10 = vpop.f32.mrf.mxu1  ;;  %v568_v11 = vpop.f32.mrf.mxu0 }
 0x5df   :  { %v624_v12 = vand.u32 2147483647, %v619_v10  ;;  %736 = vrot.lane.b32.xlu1 %v626_v9, %s1292_s17  ;;  %v627_v21 = vpack.c.bf16 %v568_v11, %v568_v11 }
 0x5e0   :  { %v1018_v13 = vpop.f32.mrf.mxu1  ;;  %v1012_v15 = vpop.f32.mrf.mxu0 }
 0x5e1   :  { %v628_v16 = vpack.c.bf16 %v624_v12, %v624_v12 }
 0x5e3   :  { %632 = vrot.lane.b32.xlu0 %v628_v16, %s1292_s17  ;;  %825 = vperm.xlu1 %1068, %v822_v26  }
 0x5e7   :  { %635 = vrot.lane.b32.xlu0 %v630_v17, %s1285_s10 }
 0x651   :  { %v737_v19 = vpop.permute.xlu1 %736 }
 0x652   :  { %v740_v20 = vsel %vm294_vm5, %v625_v18, %v737_v19 }
 0x653   :  { %1044 = vmatmul.mubr.msk.bf16.vlgmr.msra.gmra.mxu1 %vm640_vm6, %v740_v20 }
 0x654   :  { %1049 = vmatprep.mubr.msk.bf16.mxu1 %vm1291_vm0, %v1290_v1  ;;  %v655_v1 = vld [vmem:[%s1548_s15] sm:$0x1]  ;;  %s1294_s15 = smov [#allocation17]  }
 0x655   :  { %v633_v22 = vpop.permute.xlu0 %632  ;;  %s886_s23 = sshll.u32 %s1294_s15, 4  ;;  %s887_s23 = int_to_ptr.vmem [resolvable:$true] %s886_s23 }
 0x656   :  { %v639_v23 = vsel %vm294_vm5, %v627_v21, %v633_v22  ;;  %s1248_s5 = scalar_lea.vmem %s887_s23, 16  ;;  %s1252_s24 = scalar_lea.vmem %s887_s23, 32 }
 0x657   :  { %p1249_p12 = scmp.ne.s32.totalorder %s887_s23, %s1248_s5  ;;  %p1253_p13 = scmp.lt.s32.totalorder %s887_s23, %s887_s23 }
 0x658   :  { %p1254_p0 = scmp.lt.s32.totalorder %s1252_s24, %s1248_s5 }
 0x659   :  { %v636_v24 = vpop.permute.xlu0 %635 }
 0x65a   :  { %v642_v25 = vsel %vm640_vm6, %v639_v23, %v636_v24  ;;  %p1255_p1 = por %p1254_p0, %p1253_p13 }
 0x65b   :  { %1032 = vmatmul.mubr.msk.bf16.vlgmr.msra.gmra.mxu0 %vm692_vm7, %v642_v25 }
 0x65c   :  { %p1256_p2 = pnand %p1255_p1, %p1249_p12 }
 0x65e   :  { %v826_v46 = vpop.permute.xlu1 %825 }
 0x65f   :  { %v831_v47 = vrot.slane %v826_v46, %v751_v34 }
 0x713   :  { %v813_v29 = vpop.f32.mrf.mxu1 }
 0x715   :  { %v1045_v30 = vpop.f32.mrf.mxu1 }
 0x717   :  { %v816_v32 = vpop.f32.mrf.mxu1 }
 0x719   :  { %v1046_v33 = vpop.f32.mrf.mxu1 }
 0x71b   :  { %v729_v35 = vpop.f32.mrf.mxu0 }
 0x71c   :  { %v730_v36 = vadd.f32 %v729_v35, %v655_v1 }
 0x71d   :  { %v1033_v37 = vpop.f32.mrf.mxu0 }
 0x71e   :  { %v752_v38 = vrot.slane %v730_v36, %v751_v34 }
 0x71f   :  { %v732_v39 = vpop.f32.mrf.mxu0 }
 0x720   :  { %v814_v40 = vadd.f32 %v813_v29, %v752_v38 }
 0x721   :  { %v1034_v41 = vpop.f32.mrf.mxu0 }
 0x722   :  { %v819_v42 = vmax.f32 %v814_v40, 0.0 }
 0x724   :  { %v821_v43 = vpack.c.bf16 %v819_v42, %v819_v42 }
 0x726   :  { %v836_v44 = vsel %vm294_vm5, %v821_v43, 0 }
 0x727   :  { %1048 = vmatpush3.bf16.xpose.msra.mxu1 %v836_v44 }
 0x72e   :  { %1050 = vmatmul.mubr.msk.bf16.vlgmr.msra.gmra.mxu1 %vm294_vm5, %v820_v45 }
 0x7ee   :  { %v872_v48 = vpop.f32.mrf.mxu1 }
 0x7ef   :  { %v873_v49 = vadd.f32 %v872_v48, %v831_v47 }
 0x7f0   :  { %v1051_v50 = vpop.f32.mrf.mxu1 }
 0x7f1   :  { %879 = vst.msk [vmem:[#allocation17] sm:$0x1] %vm878_vm8, %v873_v49 }
 0x7f2   :  { %v875_v51 = vpop.f32.mrf.mxu1 }
 0x7f3   :  { %1259 = shalt.err (!%p1256_p2)
}
 0x7f4   :  { %889 = dma.vmem_to_hbm [thread:$0]  %s887_s23, 16, %s1551_s18, [#allocation5]   ;;  %v1052_v52 = vpop.f32.mrf.mxu1 }
 0x7f5   :  { %1278 = dma.done.wait [#allocation5], 16  }
 0x7f6   :  { %1279 = vsyncadd [#allocation5], 4294967280 }
 0x7f7   :  { %893 = vsyncpa [#allocation4], 1 }
 0x7f8   :  { %894 = vsyncpa [#allocation7], 1 }
 0x7f9   :  { %895 = vsyncpa [#allocation10], 1 }
 0x7fa   :  { %896 = vsyncpa [#allocation13], 1 }
 0x7fb   :  { %897 = vsyncpa [#allocation16], 1 }
 0x7fc   :  { %898 = vsyncpa [#allocation5], 1 }

</bundles_post_ra>
